<compile_context>
chip_gen: v5e
topology: v5e:2x2
jax: 0.10.0
libtpu: 0.0.40
codegen_flags: <defaults>
</compile_context>

<pallas_src>
import jax
import jax.numpy as jnp
from jax.experimental import pallas as pl
from jax.experimental.pallas import tpu as pltpu

LANE = 128
SUBLANE = 8
MAX_ROW_TILE = 4096      # (4096, 128) f32 = 2 MiB per input per grid step


def _cdiv(a, b):
    return -(-a // b)


def _round_up(a, b):
    return _cdiv(a, b) * b


def _tensorcores_per_device():
    """Best-effort TensorCore count (for the megacore grid split)."""
    try:
        kind = jax.devices()[0].device_kind.lower()
    except Exception:
        return 1
    # v4 / v5p (megacore) and v7x expose 2 TensorCores per Pallas device;
    # v5e / v6e are single-TC. Unknown kinds fall back to 1 (always correct).
    return 2 if any(m in kind for m in ("v4", "v5p", "v7", "7x")) else 1


def _make_kernel(rows, row_tile, tiles_per_split, two_axis):
    def kernel(x_ref, t_ref, e_ref, out_ref):
        if two_axis:
            c = pl.program_id(0)                 # TensorCore split (parallel)
            i = pl.program_id(1)                 # row-tile loop    (arbitrary)
            tile_idx = c * tiles_per_split + i
        else:
            i = pl.program_id(0)                 # row-tile loop    (arbitrary)
            tile_idx = i

        @pl.when(i == 0)
        def _():
            out_ref[...] = jnp.zeros_like(out_ref)

        x = x_ref[...].astype(jnp.float32)
        t = t_ref[...].astype(jnp.float32)
        e = e_ref[...].astype(jnp.float32)

        # BCE with PyTorch's per-term clamp at -100:
        #   -(t*log(x) + (1-t)*log(1-x)) == -(log1mx + t*(logx - log1mx))
        # The two logs ride the EUP slot; the mul/add is VPU filler under DMA.
        log_x = jnp.maximum(jnp.log(x), -100.0)
        log_1mx = jnp.maximum(jnp.log(1.0 - x), -100.0)
        bce = -(log_1mx + t * (log_x - log_1mx))
        contrib = jnp.where(e > 0.8, bce, 0.0)

        def _accumulate(v):
            # (row_tile,128) -> (row_tile//8, 8, 128) partial sums: pure VPU
            # adds per step; the single cross-lane reduce happens once in the
            # wrapper on a tiny array.
            out_ref[...] += v.reshape(row_tile // SUBLANE, SUBLANE, LANE).sum(axis=0)

        row_start = tile_idx * row_tile
        rows_rem = rows - row_start              # valid rows in this tile

        # Fast path (all but at most one grid step): every row is real data,
        # no mask VALU work at all.
        @pl.when(rows_rem >= row_tile)
        def _():
            _accumulate(contrib)

        # Slow path: ragged last tile (partial DMA -> stale VMEM rows) or a
        # phantom tile of an inexact megacore split (rows_rem <= 0). The
        # wrapper already zero-pads the sub-lane-row tail, so masking whole
        # rows is sufficient; garbage rows are select-masked to 0 so NaN/Inf
        # from stale VMEM cannot poison the sum.
        @pl.when(rows_rem < row_tile)
        def _():
            row_ids = jax.lax.broadcasted_iota(jnp.int32, (row_tile, LANE), 0)
            _accumulate(jnp.where(row_ids < rows_rem, contrib, 0.0))

    return kernel


@jax.jit
def edge_att_bce_loss(inp, target, edge):
    """Pallas implementation of EdgeAttBinaryCrossEntropyLoss.forward."""
    assert inp.shape == target.shape == edge.shape
    n_elem = inp.size

    def as_rows(a):
        a = a.reshape(-1)
        rem = a.shape[0] % LANE
        if rem:  # only when numel % 128 != 0 (pads < 128 elements; edge pad=0 -> weight 0)
            a = jnp.pad(a, (0, LANE - rem))
        return a.reshape(-1, LANE)

    x2, t2, e2 = as_rows(inp), as_rows(target), as_rows(edge)
    rows = x2.shape[0]

    # Sub-lane alignment of the row tile: 8 for f32, 16 for bf16, 32 for 8-bit.
    align = max(SUBLANE, *(32 // max(a.dtype.itemsize, 1) for a in (x2, t2, e2)))

    row_tile = min(MAX_ROW_TILE, _round_up(rows, align))
    n_tiles = _cdiv(rows, row_tile)

    nsplit = _tensorcores_per_device() if n_tiles >= 2 else 1
    if nsplit > 1 and n_tiles % nsplit:
        # Nudge row_tile down so the megacore split is exact (no phantom tile
        # wasting 3 full-tile DMAs on one core, no clamp in the hot index_map).
        cand = min(MAX_ROW_TILE, _round_up(_cdiv(rows, n_tiles + 1), align))
        if _cdiv(rows, cand) % nsplit == 0:
            row_tile = cand
            n_tiles = _cdiv(rows, cand)

    tiles_per_split = _cdiv(n_tiles, nsplit)
    has_phantom = nsplit * tiles_per_split > n_tiles
    two_axis = nsplit > 1

    if two_axis:
        grid = (nsplit, tiles_per_split)
        dims = ("parallel", "arbitrary")
        if has_phantom:
            # Fallback: clamp the DMA source; the kernel row-mask zeroes it.
            def in_map(c, i):
                return (jnp.minimum(c * tiles_per_split + i, n_tiles - 1), 0)
        else:
            def in_map(c, i):
                return (c * tiles_per_split + i, 0)
        out_map = lambda c, i: (c, 0)
    else:
        grid = (n_tiles,)
        dims = ("arbitrary",)
        in_map = lambda i: (i, 0)
        out_map = lambda i: (0, 0)

    in_bytes = sum(a.size * a.dtype.itemsize for a in (x2, t2, e2))
    out_bytes = nsplit * SUBLANE * LANE * 4

    partials = pl.pallas_call(
        _make_kernel(rows, row_tile, tiles_per_split, two_axis),
        out_shape=jax.ShapeDtypeStruct((nsplit * SUBLANE, LANE), jnp.float32),
        grid_spec=pltpu.PrefetchScalarGridSpec(
            num_scalar_prefetch=0,
            grid=grid,
            in_specs=[
                pl.BlockSpec((row_tile, LANE), in_map),
                pl.BlockSpec((row_tile, LANE), in_map),
                pl.BlockSpec((row_tile, LANE), in_map),
            ],
            out_specs=pl.BlockSpec((SUBLANE, LANE), out_map),
        ),
        compiler_params=pltpu.CompilerParams(dimension_semantics=dims),
        cost_estimate=pl.CostEstimate(
            flops=8 * n_elem,
            transcendentals=2 * n_elem,
            bytes_accessed=in_bytes + out_bytes),
    )(x2, t2, e2)

    # PyTorch BCE 'mean' divides by numel, not by the number of active weights.
    return jnp.sum(partials) / jnp.float32(n_elem)


def _reference(inp, target, edge):
    """Pure-JAX reference for sanity checking."""
    w = jnp.where(edge > 0.8, 1.0, 0.0)
    log_x = jnp.maximum(jnp.log(inp), -100.0)
    log_1mx = jnp.maximum(jnp.log(1.0 - inp), -100.0)
    return jnp.mean(-w * (target * log_x + (1.0 - target) * log_1mx))


if __name__ == "__main__":
    def make_inputs(k, shape):
        k1, k2, k3 = jax.random.split(k, 3)
        inp = jax.nn.sigmoid(jax.random.normal(k1, shape, dtype=jnp.float32))
        target = (jax.random.uniform(k2, shape) > 0.5).astype(jnp.float32)
        edge = jax.random.uniform(k3, shape, dtype=jnp.float32)
        return inp, target, edge

    # Primary small NCHW case from the module spec.
    inp, target, edge = make_inputs(jax.random.PRNGKey(0), (2, 4, 16, 16))
    out = jax.block_until_ready(edge_att_bce_loss(inp, target, edge))
    ref = jax.block_until_ready(_reference(inp, target, edge))
    assert jnp.allclose(out, ref, rtol=1e-5, atol=1e-6), (out, ref)

    # Ragged numel (% 128 != 0): exercises the lane-tail pad + masked row path.
    inp, target, edge = make_inputs(jax.random.PRNGKey(1), (3, 5, 37, 29))
    out = jax.block_until_ready(edge_att_bce_loss(inp, target, edge))
    ref = jax.block_until_ready(_reference(inp, target, edge))
    assert jnp.allclose(out, ref, rtol=1e-5, atol=1e-6), (out, ref)

    # Multi-tile case: exercises the accumulation loop (and the core split /
    # exact-split logic on multi-TC chips).
    inp, target, edge = make_inputs(jax.random.PRNGKey(2), (8, 16, 96, 96))
    out = jax.block_until_ready(edge_att_bce_loss(inp, target, edge))
    ref = jax.block_until_ready(_reference(inp, target, edge))
    assert jnp.allclose(out, ref, rtol=1e-4, atol=1e-6), (out, ref)

    print("KERNEL_OK")
</pallas_src>

<mosaic_0001>
module attributes {stable_mosaic.version = 11 : i64} {
  func.func @kernel(%arg0: i32, %arg1: memref<16x128xf32, #tpu.memory_space<vmem>>, %arg2: memref<16x128xf32, #tpu.memory_space<vmem>>, %arg3: memref<16x128xf32, #tpu.memory_space<vmem>>, %arg4: memref<8x128xf32, #tpu.memory_space<vmem>>) attributes {dimension_semantics = [#tpu.dimension_semantics<arbitrary>], iteration_bounds = array<i64: 1>, scalar_prefetch = 0 : i64, scratch_operands = 0 : i64, tpu.core_type = #tpu.core_type<tc>, window_params = [{transform_indices = @transform_0, window_bounds = array<i64: 16, 128>}, {transform_indices = @transform_1, window_bounds = array<i64: 16, 128>}, {transform_indices = @transform_2, window_bounds = array<i64: 16, 128>}, {pipeline_mode = #tpu.pipeline_mode<synchronous>, transform_indices = @transform_3, window_bounds = array<i64: 8, 128>}]} {
    %c0_i32 = arith.constant 0 : i32
    %0 = arith.cmpi eq, %arg0, %c0_i32 : i32
    %1 = arith.extui %0 : i1 to i32
    %c0_i32_0 = arith.constant 0 : i32
    %2 = arith.cmpi ne, %1, %c0_i32_0 : i32
    scf.if %2 {
      %cst_16 = arith.constant 0.000000e+00 : f32
      %31 = vector.broadcast %cst_16 : f32 to vector<8x128xf32>
      %c0_17 = arith.constant 0 : index
      %c0_18 = arith.constant 0 : index
      %32 = vector.load %arg4[%c0_17, %c0_18] : memref<8x128xf32, #tpu.memory_space<vmem>>, vector<8x128xf32>
      tpu.vector_store %arg4[%c0_17, %c0_18], %31 {strides = array<i32>} : memref<8x128xf32, #tpu.memory_space<vmem>>, vector<8x128xf32>,
    } else {
    }
    %c0 = arith.constant 0 : index
    %c0_1 = arith.constant 0 : index
    %3 = vector.load %arg1[%c0, %c0_1] : memref<16x128xf32, #tpu.memory_space<vmem>>, vector<16x128xf32>
    %c0_2 = arith.constant 0 : index
    %c0_3 = arith.constant 0 : index
    %4 = vector.load %arg2[%c0_2, %c0_3] : memref<16x128xf32, #tpu.memory_space<vmem>>, vector<16x128xf32>
    %c0_4 = arith.constant 0 : index
    %c0_5 = arith.constant 0 : index
    %5 = vector.load %arg3[%c0_4, %c0_5] : memref<16x128xf32, #tpu.memory_space<vmem>>, vector<16x128xf32>
    %6 = math.log %3 : vector<16x128xf32>
    %cst = arith.constant -1.000000e+02 : f32
    %7 = vector.broadcast %cst : f32 to vector<16x128xf32>
    %8 = arith.maximumf %6, %7 : vector<16x128xf32>
    %cst_6 = arith.constant 1.000000e+00 : f32
    %9 = vector.broadcast %cst_6 : f32 to vector<16x128xf32>
    %10 = arith.subf %9, %3 : vector<16x128xf32>
    %11 = math.log %10 : vector<16x128xf32>
    %cst_7 = arith.constant -1.000000e+02 : f32
    %12 = vector.broadcast %cst_7 : f32 to vector<16x128xf32>
    %13 = arith.maximumf %11, %12 : vector<16x128xf32>
    %14 = arith.subf %8, %13 : vector<16x128xf32>
    %15 = arith.mulf %4, %14 : vector<16x128xf32>
    %16 = arith.addf %13, %15 : vector<16x128xf32>
    %cst_8 = arith.constant 0.000000e+00 : f32
    %17 = vector.broadcast %cst_8 : f32 to vector<16x128xf32>
    %18 = arith.subf %17, %16 : vector<16x128xf32>
    %cst_9 = arith.constant 8.000000e-01 : f32
    %19 = vector.broadcast %cst_9 : f32 to vector<16x128xf32>
    %20 = arith.cmpf ogt, %5, %19 : vector<16x128xf32>
    %cst_10 = arith.constant 0.000000e+00 : f32
    %21 = vector.broadcast %cst_10 : f32 to vector<16x128xf32>
    %22 = arith.select %20, %18, %21 : vector<16x128xi1>, vector<16x128xf32>
    %c16_i32 = arith.constant 16 : i32
    %23 = arith.muli %arg0, %c16_i32 : i32
    %c16_i32_11 = arith.constant 16 : i32
    %24 = arith.subi %c16_i32_11, %23 : i32
    %c16_i32_12 = arith.constant 16 : i32
    %25 = arith.cmpi sge, %24, %c16_i32_12 : i32
    %26 = arith.extui %25 : i1 to i32
    %c0_i32_13 = arith.constant 0 : i32
    %27 = arith.cmpi ne, %26, %c0_i32_13 : i32
    scf.if %27 {
      %c0_16 = arith.constant 0 : index
      %c0_17 = arith.constant 0 : index
      %31 = vector.load %arg4[%c0_16, %c0_17] : memref<8x128xf32, #tpu.memory_space<vmem>>, vector<8x128xf32>
      %32 = vector.shape_cast %22 : vector<16x128xf32> to vector<2x8x128xf32>
      %cst_18 = arith.constant dense<0.000000e+00> : vector<8x128xf32>
      %33 = vector.multi_reduction <add>, %32, %cst_18 [0] : vector<2x8x128xf32> to vector<8x128xf32>
      %34 = arith.addf %31, %33 : vector<8x128xf32>
      %c0_19 = arith.constant 0 : index
      %c0_20 = arith.constant 0 : index
      %35 = vector.load %arg4[%c0_19, %c0_20] : memref<8x128xf32, #tpu.memory_space<vmem>>, vector<8x128xf32>
      tpu.vector_store %arg4[%c0_19, %c0_20], %34 {strides = array<i32>} : memref<8x128xf32, #tpu.memory_space<vmem>>, vector<8x128xf32>,
    } else {
    }
    %c16_i32_14 = arith.constant 16 : i32
    %28 = arith.cmpi slt, %24, %c16_i32_14 : i32
    %29 = arith.extui %28 : i1 to i32
    %c0_i32_15 = arith.constant 0 : i32
    %30 = arith.cmpi ne, %29, %c0_i32_15 : i32
    scf.if %30 {
      %31 = tpu.iota {dimensions = array<i32: 0>} : vector<16x128xi32>
      %32 = vector.broadcast %24 : i32 to vector<16x128xi32>
      %33 = arith.cmpi slt, %31, %32 : vector<16x128xi32>
      %cst_16 = arith.constant 0.000000e+00 : f32
      %34 = vector.broadcast %cst_16 : f32 to vector<16x128xf32>
      %35 = arith.select %33, %22, %34 : vector<16x128xi1>, vector<16x128xf32>
      %c0_17 = arith.constant 0 : index
      %c0_18 = arith.constant 0 : index
      %36 = vector.load %arg4[%c0_17, %c0_18] : memref<8x128xf32, #tpu.memory_space<vmem>>, vector<8x128xf32>
      %37 = vector.shape_cast %35 : vector<16x128xf32> to vector<2x8x128xf32>
      %cst_19 = arith.constant dense<0.000000e+00> : vector<8x128xf32>
      %38 = vector.multi_reduction <add>, %37, %cst_19 [0] : vector<2x8x128xf32> to vector<8x128xf32>
      %39 = arith.addf %36, %38 : vector<8x128xf32>
      %c0_20 = arith.constant 0 : index
      %c0_21 = arith.constant 0 : index
      %40 = vector.load %arg4[%c0_20, %c0_21] : memref<8x128xf32, #tpu.memory_space<vmem>>, vector<8x128xf32>
      tpu.vector_store %arg4[%c0_20, %c0_21], %39 {strides = array<i32>} : memref<8x128xf32, #tpu.memory_space<vmem>>, vector<8x128xf32>,
    } else {
    }
    return
  }
  func.func @transform_0(%arg0: i32) -> (i32, i32) {
    %c0_i32 = arith.constant 0 : i32
    %c0_i32_0 = arith.constant 0 : i32
    return %arg0, %c0_i32 : i32, i32
  }
  func.func @transform_1(%arg0: i32) -> (i32, i32) {
    %c0_i32 = arith.constant 0 : i32
    %c0_i32_0 = arith.constant 0 : i32
    return %arg0, %c0_i32 : i32, i32
  }
  func.func @transform_2(%arg0: i32) -> (i32, i32) {
    %c0_i32 = arith.constant 0 : i32
    %c0_i32_0 = arith.constant 0 : i32
    return %arg0, %c0_i32 : i32, i32
  }
  func.func @transform_3(%arg0: i32) -> (i32, i32) {
    %c0_i32 = arith.constant 0 : i32
    %c0_i32_0 = arith.constant 0 : i32
    %c0_i32_1 = arith.constant 0 : i32
    return %c0_i32, %c0_i32_0 : i32, i32
  }
}

</mosaic_0001>

<bundles_post_ra>
// kernel: edge_att_bce_loss.1
= control target key start
LH: loop header
LB: loop body
LE: loop exit
PB: predicated region body
PF: predicated region fallthrough
CT: control target
= control target key end

     0   :  { %s131_s0 = inlined_call_operand.vmem [shape: f32[16,128], index: 0, kind: input, shape index: {}]   ;;  %s132_s1 = inlined_call_operand.vmem [shape: f32[16,128], index: 1, kind: input, shape index: {}]   ;;  %s133_s2 = inlined_call_operand.vmem [shape: f32[16,128], index: 2, kind: input, shape index: {}]   ;;  %s134_s3 = inlined_call_operand.vmem [shape: f32[8,128], index: 3, kind: output, shape index: {}]  }
   0x1   :  { %v19_v0 = vld [vmem:[%s131_s0] sm:$0xff]  ;;  %v20_v1 = vld [vmem:[%s131_s0 + $0x8] sm:$0xff] }
   0x2   :  { %82 = vlog2.f32 %v19_v0  ;;  %v31_v2 = vsub.f32 1.0, %v19_v0  ;;  %v32_v3 = vsub.f32 1.0, %v20_v1  ;;  %v21_v15 = vld [vmem:[%s132_s1] sm:$0xff]  ;;  %v22_v17 = vld [vmem:[%s132_s1 + $0x8] sm:$0xff] }
   0x3   :  { %84 = vlog2.f32 %v20_v1  ;;  %v23_v20 = vld [vmem:[%s133_s2] sm:$0xff]  ;;  %v24_v22 = vld [vmem:[%s133_s2 + $0x8] sm:$0xff] }
   0x4   :  { %86 = vlog2.f32 %v31_v2  ;;  %vm47_vm0 = vcmp.gt.f32.partialorder %v23_v20, 0.8  ;;  %vm48_vm1 = vcmp.gt.f32.partialorder %v24_v22, 0.8 }
   0x5   :  { %88 = vlog2.f32 %v32_v3 }
   0x8   :  { %v83_v4 = vpop.eup %82 }
   0x9   :  { %v85_v5 = vpop.eup %84  ;;  %v26_v6 = vmul.f32 0.6931472, %v83_v4 }
   0xa   :  { %v87_v7 = vpop.eup %86  ;;  %v28_v8 = vmul.f32 0.6931472, %v85_v5 }
   0xb   :  { %v89_v9 = vpop.eup %88  ;;  %v29_v10 = vmax.f32 %v26_v6, -100.0  ;;  %v34_v11 = vmul.f32 0.6931472, %v87_v7 }
   0xc   :  { %v30_v12 = vmax.f32 %v28_v8, -100.0  ;;  %v36_v13 = vmul.f32 0.6931472, %v89_v9 }
   0xd   :  { %v37_v14 = vmax.f32 %v34_v11, -100.0 }
   0xe   :  { %v38_v16 = vmax.f32 %v36_v13, -100.0 }
   0xf   :  { %v39_v18 = vsub.f32 %v29_v10, %v37_v14 }
  0x10   :  { %v40_v19 = vsub.f32 %v30_v12, %v38_v16 }
  0x11   :  { %v41_v21 = vmul.f32 %v39_v18, %v21_v15 }
  0x12   :  { %v42_v23 = vmul.f32 %v40_v19, %v22_v17 }
  0x13   :  { %v43_v24 = vadd.f32 %v41_v21, %v37_v14 }
  0x14   :  { %v44_v25 = vadd.f32 %v42_v23, %v38_v16 }
  0x15   :  { %v45_v26 = vsub.f32 0.0, %v43_v24 }
  0x16   :  { %v46_v27 = vsub.f32 0.0, %v44_v25 }
  0x17   :  { %v49_v28 = vsel %vm47_vm0, %v45_v26, 0.0 }
  0x18   :  { %v50_v29 = vsel %vm48_vm1, %v46_v27, 0.0 }
  0x19   :  { %v58_v30 = vadd.f32 %v50_v29, %v49_v28 }
  0x1b   :  { %60 = vst [vmem:[%s134_s3] sm:$0xff] %v58_v30 }

</bundles_post_ra>
